<compile_context>
chip_gen: v7x
topology: tpu7x:2x2x1
jax: 0.10.0
libtpu: 0.0.40
codegen_flags: <defaults>
</compile_context>

<pallas_src>
import math
from functools import partial

import jax
import jax.numpy as jnp
from jax.experimental import pallas as pl
from jax.experimental.pallas import tpu as pltpu

block_size = 64
n_embed = 128
head_size = 32
dropout = 0.1  # eval mode -> identity


def head_kernel(x_ref, w_ref, o_ref, *, batches_per_block, seq_len, scale):
    # x_ref: (bb*T, C)   w_ref: (3, C, H) stacked [Wk, Wq, Wv]   o_ref: (bb*T, H)
    bb, T = batches_per_block, seq_len

    x = x_ref[...]                                                        # (bb*T, C) f32

    # Projections: leading-axis indexing of the stacked weight gives aligned (C, H)
    # MXU operands (no lane-offset slicing of a fused result).
    k = jnp.dot(x, w_ref[0], preferred_element_type=jnp.float32)          # (bb*T, H)
    q = jnp.dot(x, w_ref[1], preferred_element_type=jnp.float32) * scale  # scale small tile
    v = jnp.dot(x, w_ref[2], preferred_element_type=jnp.float32)          # (bb*T, H)

    # Causal (lower-triangular) mask, built once and reused per batch.
    row = jax.lax.broadcasted_iota(jnp.int32, (T, T), 0)
    col = jax.lax.broadcasted_iota(jnp.int32, (T, T), 1)
    causal = col <= row

    for i in range(bb):                                # bb is a small static int (1 or B)
        lo, hi = i * T, (i + 1) * T
        qs = q[lo:hi, :]
        ks = k[lo:hi, :]
        vs = v[lo:hi, :]

        # q @ k^T with the transpose absorbed into the contraction spec.
        wei = jax.lax.dot_general(
            qs, ks,
            dimension_numbers=(((1,), (1,)), ((), ())),
            preferred_element_type=jnp.float32,
        )                                              # (T, T)
        wei = jnp.where(causal, wei, -jnp.inf)

        # Numerically-stable softmax with an EXACT f32 reciprocal of the (T,1) denom.
        m = jnp.max(wei, axis=-1, keepdims=True)
        e = jnp.exp(wei - m)
        denom = jnp.sum(e, axis=-1, keepdims=True)
        p = e * (1.0 / denom)

        # dropout: identity (eval mode)

        out = jnp.dot(p, vs, preferred_element_type=jnp.float32)          # (T, H)
        o_ref[lo:hi, :] = out.astype(o_ref.dtype)


def head_forward(x, wk, wq, wv):
    """x: (B, T, C) f32; wk/wq/wv: (C, H) f32 (pre-transposed nn.Linear weights)."""
    B, T, C = x.shape
    H = wk.shape[1]

    w = jnp.stack([wk, wq, wv], axis=0)               # (3, C, H)
    x2d = x.reshape(B * T, C)                         # fold batch into the matmul M dim
    scale = 1.0 / math.sqrt(C)                        # reference divides by sqrt(n_embed)

    # Generation-aware grid:
    #   v7x (2 TensorCores/chip): one batch per grid step, sharded across cores.
    #   v5e/v6e (1 TensorCore):   single grid step, whole batch in one wide matmul.
    try:
        kind = jax.devices()[0].device_kind.lower()
    except Exception:
        kind = ""
    dual_core = "7" in kind
    if dual_core and B > 1:
        bb, grid = 1, (B,)
    else:
        bb, grid = B, (1,)

    out2d = pl.pallas_call(
        partial(head_kernel, batches_per_block=bb, seq_len=T, scale=scale),
        out_shape=jax.ShapeDtypeStruct((B * T, H), x.dtype),
        grid=grid,
        in_specs=[
            pl.BlockSpec((bb * T, C), lambda b: (b, 0)),
            pl.BlockSpec((3, C, H), lambda b: (0, 0, 0)),   # weights stay resident
        ],
        out_specs=pl.BlockSpec((bb * T, H), lambda b: (b, 0)),
        compiler_params=pltpu.CompilerParams(
            dimension_semantics=("parallel",),
        ),
    )(x2d, w)

    return out2d.reshape(B, T, H)


def reference_forward(x, wk, wq, wv):
    """Plain-JAX reference mirroring the PyTorch module (eval mode)."""
    B, T, C = x.shape
    k = x @ wk
    q = x @ wq
    v = x @ wv
    wei = (q @ jnp.swapaxes(k, -2, -1)) / math.sqrt(C)
    tril = jnp.tril(jnp.ones((T, T), dtype=bool))
    wei = jnp.where(tril, wei, -jnp.inf)
    wei = jax.nn.softmax(wei, axis=-1)
    return wei @ v


if __name__ == "__main__":
    key = jax.random.PRNGKey(0)
    kx, kk, kq, kv = jax.random.split(key, 4)

    B, T, C, H = 2, block_size, n_embed, head_size

    x = jax.random.normal(kx, (B, T, C), dtype=jnp.float32)
    # nn.Linear(n_embed, head_size, bias=False) weight has shape (H, C);
    # we store it pre-transposed as (C, H) so the kernel does x @ W directly.
    bound = 1.0 / math.sqrt(C)
    wk = jax.random.uniform(kk, (C, H), minval=-bound, maxval=bound, dtype=jnp.float32)
    wq = jax.random.uniform(kq, (C, H), minval=-bound, maxval=bound, dtype=jnp.float32)
    wv = jax.random.uniform(kv, (C, H), minval=-bound, maxval=bound, dtype=jnp.float32)

    out = jax.block_until_ready(head_forward(x, wk, wq, wv))
    ref = reference_forward(x, wk, wq, wv)

    assert out.shape == (B, T, H), out.shape
    # Tolerance covers the gap between in-kernel f32 MXU matmuls and XLA's
    # default-precision f32 matmuls in the plain-JAX reference; the kernel itself
    # uses exact f32 softmax math.
    assert jnp.allclose(out, ref, atol=1e-2, rtol=1e-2), "mismatch vs reference"

    print("KERNEL_OK")
</pallas_src>

<mosaic_0001>
module attributes {stable_mosaic.version = 11 : i64} {
  func.func @head_kernel(%arg0: i32, %arg1: memref<128x128xf32, #tpu.memory_space<vmem>>, %arg2: memref<3x128x32xf32, #tpu.memory_space<vmem>>, %arg3: memref<128x32xf32, #tpu.memory_space<vmem>>) attributes {dimension_semantics = [#tpu.dimension_semantics<parallel>], iteration_bounds = array<i64: 1>, scalar_prefetch = 0 : i64, scratch_operands = 0 : i64, tpu.core_type = #tpu.core_type<tc>, window_params = [{transform_indices = @transform_0, window_bounds = array<i64: 128, 128>}, {pipeline_mode = #tpu.pipeline_mode<synchronous>, transform_indices = @transform_1, window_bounds = array<i64: 3, 128, 32>}, {transform_indices = @transform_2, window_bounds = array<i64: 128, 32>}]} {
    %c0 = arith.constant 0 : index
    %c0_0 = arith.constant 0 : index
    %0 = vector.load %arg1[%c0, %c0_0] : memref<128x128xf32, #tpu.memory_space<vmem>>, vector<128x128xf32>
    %c0_1 = arith.constant 0 : index
    %c0_2 = arith.constant 0 : index
    %c0_3 = arith.constant 0 : index
    %1 = vector.load %arg2[%c0_1, %c0_2, %c0_3] : memref<3x128x32xf32, #tpu.memory_space<vmem>>, vector<1x128x32xf32>
    %2 = vector.shape_cast %1 : vector<1x128x32xf32> to vector<128x32xf32>
    %cst = arith.constant dense<0.000000e+00> : vector<128x32xf32>
    %3 = tpu.matmul %0, %2, %cst {dimension_numbers = #tpu.dot_dimension_numbers<[1], [0], [0], [1], [0, 0, 1, 1], [], []>} : vector<128x128xf32>, vector<128x32xf32>, vector<128x32xf32> -> vector<128x32xf32>
    %c1 = arith.constant 1 : index
    %c0_4 = arith.constant 0 : index
    %c0_5 = arith.constant 0 : index
    %4 = vector.load %arg2[%c1, %c0_4, %c0_5] : memref<3x128x32xf32, #tpu.memory_space<vmem>>, vector<1x128x32xf32>
    %5 = vector.shape_cast %4 : vector<1x128x32xf32> to vector<128x32xf32>
    %cst_6 = arith.constant dense<0.000000e+00> : vector<128x32xf32>
    %6 = tpu.matmul %0, %5, %cst_6 {dimension_numbers = #tpu.dot_dimension_numbers<[1], [0], [0], [1], [0, 0, 1, 1], [], []>} : vector<128x128xf32>, vector<128x32xf32>, vector<128x32xf32> -> vector<128x32xf32>
    %cst_7 = arith.constant 0.0883883461 : f32
    %7 = vector.broadcast %cst_7 : f32 to vector<128x32xf32>
    %8 = arith.mulf %6, %7 : vector<128x32xf32>
    %c2 = arith.constant 2 : index
    %c0_8 = arith.constant 0 : index
    %c0_9 = arith.constant 0 : index
    %9 = vector.load %arg2[%c2, %c0_8, %c0_9] : memref<3x128x32xf32, #tpu.memory_space<vmem>>, vector<1x128x32xf32>
    %10 = vector.shape_cast %9 : vector<1x128x32xf32> to vector<128x32xf32>
    %cst_10 = arith.constant dense<0.000000e+00> : vector<128x32xf32>
    %11 = tpu.matmul %0, %10, %cst_10 {dimension_numbers = #tpu.dot_dimension_numbers<[1], [0], [0], [1], [0, 0, 1, 1], [], []>} : vector<128x128xf32>, vector<128x32xf32>, vector<128x32xf32> -> vector<128x32xf32>
    %12 = tpu.iota {dimensions = array<i32: 0>} : vector<64x64xi32>
    %13 = tpu.iota {dimensions = array<i32: 1>} : vector<64x64xi32>
    %14 = arith.cmpi sle, %13, %12 : vector<64x64xi32>
    %15 = vector.extract_strided_slice %8 {offsets = [0, 0], sizes = [64, 32], strides = [1, 1]} : vector<128x32xf32> to vector<64x32xf32>
    %16 = vector.extract_strided_slice %3 {offsets = [0, 0], sizes = [64, 32], strides = [1, 1]} : vector<128x32xf32> to vector<64x32xf32>
    %17 = vector.extract_strided_slice %11 {offsets = [0, 0], sizes = [64, 32], strides = [1, 1]} : vector<128x32xf32> to vector<64x32xf32>
    %cst_11 = arith.constant dense<0.000000e+00> : vector<64x64xf32>
    %18 = tpu.matmul %15, %16, %cst_11 {dimension_numbers = #tpu.dot_dimension_numbers<[1], [1], [0], [0], [0, 0, 1, 0], [], []>} : vector<64x32xf32>, vector<64x32xf32>, vector<64x64xf32> -> vector<64x64xf32>
    %cst_12 = arith.constant 0xFF800000 : f32
    %19 = vector.broadcast %cst_12 : f32 to vector<64x64xf32>
    %20 = arith.select %14, %18, %19 : vector<64x64xi1>, vector<64x64xf32>
    %cst_13 = arith.constant dense<0xFF800000> : vector<64xf32>
    %21 = vector.multi_reduction <maximumf>, %20, %cst_13 [1] : vector<64x64xf32> to vector<64xf32>
    %22 = vector.shape_cast %21 : vector<64xf32> to vector<64x1xf32>
    %23 = vector.broadcast %22 : vector<64x1xf32> to vector<64x64xf32>
    %24 = arith.subf %20, %23 : vector<64x64xf32>
    %25 = math.exp %24 : vector<64x64xf32>
    %cst_14 = arith.constant dense<0.000000e+00> : vector<64xf32>
    %26 = vector.multi_reduction <add>, %25, %cst_14 [1] : vector<64x64xf32> to vector<64xf32>
    %27 = vector.shape_cast %26 : vector<64xf32> to vector<64x1xf32>
    %cst_15 = arith.constant 1.000000e+00 : f32
    %28 = vector.broadcast %cst_15 : f32 to vector<64x1xf32>
    %29 = arith.divf %28, %27 : vector<64x1xf32>
    %30 = vector.broadcast %29 : vector<64x1xf32> to vector<64x64xf32>
    %31 = arith.mulf %25, %30 : vector<64x64xf32>
    %cst_16 = arith.constant dense<0.000000e+00> : vector<64x32xf32>
    %32 = tpu.matmul %31, %17, %cst_16 {dimension_numbers = #tpu.dot_dimension_numbers<[1], [0], [0], [1], [0, 0, 1, 1], [], []>} : vector<64x64xf32>, vector<64x32xf32>, vector<64x32xf32> -> vector<64x32xf32>
    %c0_17 = arith.constant 0 : index
    %c0_18 = arith.constant 0 : index
    %33 = vector.load %arg3[%c0_17, %c0_18] : memref<128x32xf32, #tpu.memory_space<vmem>>, vector<64x32xf32>
    tpu.vector_store %arg3[%c0_17, %c0_18], %32 {strides = array<i32>} : memref<128x32xf32, #tpu.memory_space<vmem>>, vector<64x32xf32>,
    %34 = vector.extract_strided_slice %8 {offsets = [64, 0], sizes = [64, 32], strides = [1, 1]} : vector<128x32xf32> to vector<64x32xf32>
    %35 = vector.extract_strided_slice %3 {offsets = [64, 0], sizes = [64, 32], strides = [1, 1]} : vector<128x32xf32> to vector<64x32xf32>
    %36 = vector.extract_strided_slice %11 {offsets = [64, 0], sizes = [64, 32], strides = [1, 1]} : vector<128x32xf32> to vector<64x32xf32>
    %cst_19 = arith.constant dense<0.000000e+00> : vector<64x64xf32>
    %37 = tpu.matmul %34, %35, %cst_19 {dimension_numbers = #tpu.dot_dimension_numbers<[1], [1], [0], [0], [0, 0, 1, 0], [], []>} : vector<64x32xf32>, vector<64x32xf32>, vector<64x64xf32> -> vector<64x64xf32>
    %cst_20 = arith.constant 0xFF800000 : f32
    %38 = vector.broadcast %cst_20 : f32 to vector<64x64xf32>
    %39 = arith.select %14, %37, %38 : vector<64x64xi1>, vector<64x64xf32>
    %cst_21 = arith.constant dense<0xFF800000> : vector<64xf32>
    %40 = vector.multi_reduction <maximumf>, %39, %cst_21 [1] : vector<64x64xf32> to vector<64xf32>
    %41 = vector.shape_cast %40 : vector<64xf32> to vector<64x1xf32>
    %42 = vector.broadcast %41 : vector<64x1xf32> to vector<64x64xf32>
    %43 = arith.subf %39, %42 : vector<64x64xf32>
    %44 = math.exp %43 : vector<64x64xf32>
    %cst_22 = arith.constant dense<0.000000e+00> : vector<64xf32>
    %45 = vector.multi_reduction <add>, %44, %cst_22 [1] : vector<64x64xf32> to vector<64xf32>
    %46 = vector.shape_cast %45 : vector<64xf32> to vector<64x1xf32>
    %cst_23 = arith.constant 1.000000e+00 : f32
    %47 = vector.broadcast %cst_23 : f32 to vector<64x1xf32>
    %48 = arith.divf %47, %46 : vector<64x1xf32>
    %49 = vector.broadcast %48 : vector<64x1xf32> to vector<64x64xf32>
    %50 = arith.mulf %44, %49 : vector<64x64xf32>
    %cst_24 = arith.constant dense<0.000000e+00> : vector<64x32xf32>
    %51 = tpu.matmul %50, %36, %cst_24 {dimension_numbers = #tpu.dot_dimension_numbers<[1], [0], [0], [1], [0, 0, 1, 1], [], []>} : vector<64x64xf32>, vector<64x32xf32>, vector<64x32xf32> -> vector<64x32xf32>
    %c64 = arith.constant 64 : index
    %c0_25 = arith.constant 0 : index
    %52 = vector.load %arg3[%c64, %c0_25] : memref<128x32xf32, #tpu.memory_space<vmem>>, vector<64x32xf32>
    tpu.vector_store %arg3[%c64, %c0_25], %51 {strides = array<i32>} : memref<128x32xf32, #tpu.memory_space<vmem>>, vector<64x32xf32>,
    return
  }
  func.func @transform_0(%arg0: i32) -> (i32, i32) {
    %c0_i32 = arith.constant 0 : i32
    %c0_i32_0 = arith.constant 0 : i32
    return %arg0, %c0_i32 : i32, i32
  }
  func.func @transform_1(%arg0: i32) -> (i32, i32, i32) {
    %c0_i32 = arith.constant 0 : i32
    %c0_i32_0 = arith.constant 0 : i32
    %c0_i32_1 = arith.constant 0 : i32
    %c0_i32_2 = arith.constant 0 : i32
    return %c0_i32, %c0_i32_0, %c0_i32_1 : i32, i32, i32
  }
  func.func @transform_2(%arg0: i32) -> (i32, i32) {
    %c0_i32 = arith.constant 0 : i32
    %c0_i32_0 = arith.constant 0 : i32
    return %arg0, %c0_i32 : i32, i32
  }
}

</mosaic_0001>

<bundles_post_ra>
// kernel: tpu_custom_call.1
= control target key start
LH: loop header
LB: loop body
LE: loop exit
PB: predicated region body
PF: predicated region fallthrough
CT: control target
= control target key end

     0   :  { %vm547_vm0 = vcmask 261120   ;;  %vm709_vm3 = vcmask 523264   ;;  %s2695_s1 = inlined_call_operand.vmem [shape: f32[3,128,32], index: 1, kind: input, shape index: {}]   ;;  %s2696_s0 = inlined_call_operand.vmem [shape: f32[128,128], index: 0, kind: input, shape index: {}]   ;;  %s2697_s2 = inlined_call_operand.vmem [shape: f32[128,32], index: 2, kind: output, shape index: {}]  }
   0x1   :  { %v27_v0 = vld [vmem:[%s2695_s1] sm:$0xff]  ;;  %v28_v1 = vld [vmem:[%s2695_s1 + $0x8] sm:$0xff]  ;;  %v29_v2 = vld [vmem:[%s2695_s1 + $0x10] sm:$0xff] }
   0x2   :  { %v1861_v3 = vpack.c.bf16 %v28_v1, %v27_v0  ;;  %v30_v4 = vld [vmem:[%s2695_s1 + $0x18] sm:$0xff]  ;;  %v31_v6 = vld [vmem:[%s2695_s1 + $0x20] sm:$0xff]  ;;  %v32_v7 = vld [vmem:[%s2695_s1 + $0x28] sm:$0xff] }
   0x3   :  { %v1865_v5 = vpack.c.bf16 %v30_v4, %v29_v2  ;;  %v1869_v8 = vpack.c.bf16 %v32_v7, %v31_v6  ;;  %v2137_v9 = vld [vmem:[%s2696_s0] sm:$0xff]  ;;  %v33_v11 = vld [vmem:[%s2695_s1 + $0x30] sm:$0xff]  ;;  %v34_v12 = vld [vmem:[%s2695_s1 + $0x38] sm:$0xff] }
   0x4   :  { %1862 = vmatprep.subr.bf16.mxu0 %v1861_v3  ;;  %v1341_v10 = vld [vmem:[%s2695_s1 + $0x80] sm:$0xff]  ;;  %1613 = vmatprep.mubr.f32.mxu0 %v2137_v9  ;;  %v1342_v13 = vld [vmem:[%s2695_s1 + $0x88] sm:$0xff]  ;;  %v1343_v15 = vld [vmem:[%s2695_s1 + $0x90] sm:$0xff]  ;;  %v1873_v20 = vpack.c.bf16 %v34_v12, %v33_v11 }
   0x5   :  { %1864 = vmatpush3.bf16.msra.mxu0 %v1861_v3  ;;  %1669 = vmatprep.mubr.f32.mxu1 %v2137_v9  ;;  %v1893_v14 = vpack.c.bf16 %v1342_v13, %v1341_v10  ;;  %v1344_v16 = vld [vmem:[%s2695_s1 + $0x98] sm:$0xff]  ;;  %v1345_v18 = vld [vmem:[%s2695_s1 + $0xa0] sm:$0xff]  ;;  %v1346_v19 = vld [vmem:[%s2695_s1 + $0xa8] sm:$0xff] }
   0x6   :  { %1866 = vmatprep.subr.bf16.mxu0 %v1865_v5  ;;  %v1897_v17 = vpack.c.bf16 %v1344_v16, %v1343_v15  ;;  %v35_v21 = vld [vmem:[%s2695_s1 + $0x40] sm:$0xff]  ;;  %v36_v22 = vld [vmem:[%s2695_s1 + $0x48] sm:$0xff]  ;;  %v1901_v23 = vpack.c.bf16 %v1346_v19, %v1345_v18  ;;  %v1347_v24 = vld [vmem:[%s2695_s1 + $0xb0] sm:$0xff] }
   0x7   :  { %1894 = vmatprep.subr.bf16.mxu1 %v1893_v14  ;;  %v1348_v25 = vld [vmem:[%s2695_s1 + $0xb8] sm:$0xff]  ;;  %v1877_v26 = vpack.c.bf16 %v36_v22, %v35_v21  ;;  %v37_v27 = vld [vmem:[%s2695_s1 + $0x50] sm:$0xff]  ;;  %v1349_v30 = vld [vmem:[%s2695_s1 + $0xc0] sm:$0xff] }
   0x8   :  { %1896 = vmatpush3.bf16.msra.mxu1 %v1893_v14  ;;  %v38_v28 = vld [vmem:[%s2695_s1 + $0x58] sm:$0xff]  ;;  %v1905_v29 = vpack.c.bf16 %v1348_v25, %v1347_v24  ;;  %v1350_v31 = vld [vmem:[%s2695_s1 + $0xc8] sm:$0xff]  ;;  %v39_v33 = vld [vmem:[%s2695_s1 + $0x60] sm:$0xff] }
   0x9   :  { %1868 = vmatpush3.bf16.msra.mxu0 %v1865_v5  ;;  %1898 = vmatprep.subr.bf16.mxu1 %v1897_v17  ;;  %v1881_v32 = vpack.c.bf16 %v38_v28, %v37_v27  ;;  %v40_v34 = vld [vmem:[%s2695_s1 + $0x68] sm:$0xff]  ;;  %v1909_v35 = vpack.c.bf16 %v1350_v31, %v1349_v30  ;;  %v1351_v36 = vld [vmem:[%s2695_s1 + $0xd0] sm:$0xff]  ;;  %v1352_v37 = vld [vmem:[%s2695_s1 + $0xd8] sm:$0xff] }
   0xa   :  { %1870 = vmatprep.subr.bf16.mxu0 %v1869_v8  ;;  %v1885_v38 = vpack.c.bf16 %v40_v34, %v39_v33  ;;  %v41_v39 = vld [vmem:[%s2695_s1 + $0x70] sm:$0xff]  ;;  %v42_v40 = vld [vmem:[%s2695_s1 + $0x78] sm:$0xff]  ;;  %v1913_v41 = vpack.c.bf16 %v1352_v37, %v1351_v36  ;;  %v1353_v42 = vld [vmem:[%s2695_s1 + $0xe0] sm:$0xff] }
   0xb   :  { %v1354_v43 = vld [vmem:[%s2695_s1 + $0xe8] sm:$0xff]  ;;  %v1889_v44 = vpack.c.bf16 %v42_v40, %v41_v39  ;;  %v1357_v45 = vld [vmem:[%s2695_s1 + $0x100] sm:$0xff]  ;;  %v1355_v48 = vld [vmem:[%s2695_s1 + $0xf0] sm:$0xff] }
   0xc   :  { %1900 = vmatpush3.bf16.msra.mxu1 %v1897_v17  ;;  %v1358_v46 = vld [vmem:[%s2695_s1 + $0x108] sm:$0xff]  ;;  %v1917_v47 = vpack.c.bf16 %v1354_v43, %v1353_v42  ;;  %v1356_v49 = vld [vmem:[%s2695_s1 + $0xf8] sm:$0xff]  ;;  %v1359_v51 = vld [vmem:[%s2695_s1 + $0x110] sm:$0xff] }
   0xd   :  { %1872 = vmatpush3.bf16.msra.mxu0 %v1869_v8  ;;  %1902 = vmatprep.subr.bf16.mxu1 %v1901_v23  ;;  %v1925_v50 = vpack.c.bf16 %v1358_v46, %v1357_v45  ;;  %v1360_v52 = vld [vmem:[%s2695_s1 + $0x118] sm:$0xff]  ;;  %v1921_v53 = vpack.c.bf16 %v1356_v49, %v1355_v48  ;;  %v2234_v54 = vld [vmem:[%s2696_s0 + $0x8] sm:$0xff]  ;;  %v2239_v55 = vld [vmem:[%s2696_s0 + $0x10] sm:$0xff] }
   0xe   :  { %1874 = vmatprep.subr.bf16.mxu0 %v1873_v20  ;;  %v1929_v56 = vpack.c.bf16 %v1360_v52, %v1359_v51  ;;  %v1361_v57 = vld [vmem:[%s2695_s1 + $0x120] sm:$0xff]  ;;  %v1362_v58 = vld [vmem:[%s2695_s1 + $0x128] sm:$0xff]  ;;  %v2252_v59 = vld [vmem:[%s2696_s0 + $0x18] sm:$0xff] }
   0xf   :  { %v2257_v60 = vld [vmem:[%s2696_s0 + $0x20] sm:$0xff]  ;;  %v1933_v61 = vpack.c.bf16 %v1362_v58, %v1361_v57  ;;  %v1363_v62 = vld [vmem:[%s2695_s1 + $0x130] sm:$0xff]  ;;  %v1364_v63 = vld [vmem:[%s2695_s1 + $0x138] sm:$0xff] }
  0x10   :  { %1904 = vmatpush3.bf16.msra.mxu1 %v1901_v23  ;;  %v2270_v0 = vld [vmem:[%s2696_s0 + $0x28] sm:$0xff]  ;;  %v2275_v1 = vld [vmem:[%s2696_s0 + $0x30] sm:$0xff]  ;;  %v1937_v2 = vpack.c.bf16 %v1364_v63, %v1363_v62  ;;  %v1365_v3 = vld [vmem:[%s2695_s1 + $0x140] sm:$0xff] }
  0x11   :  { %1876 = vmatpush3.bf16.msra.mxu0 %v1873_v20  ;;  %1906 = vmatprep.subr.bf16.mxu1 %v1905_v29  ;;  %v1366_v4 = vld [vmem:[%s2695_s1 + $0x148] sm:$0xff]  ;;  %v18_v5 = vld [vmem:[%s2696_s0 + $0x38] sm:$0xff]  ;;  %v19_v6 = vld [vmem:[%s2696_s0 + $0x40] sm:$0xff] }
  0x12   :  { %1878 = vmatprep.subr.bf16.mxu0 %v1877_v26  ;;  %v1941_v7 = vpack.c.bf16 %v1366_v4, %v1365_v3  ;;  %v20_v8 = vld [vmem:[%s2696_s0 + $0x48] sm:$0xff]  ;;  %v21_v10 = vld [vmem:[%s2696_s0 + $0x50] sm:$0xff]  ;;  %v22_v11 = vld [vmem:[%s2696_s0 + $0x58] sm:$0xff] }
  0x13   :  { %v23_v12 = vld [vmem:[%s2696_s0 + $0x60] sm:$0xff]  ;;  %v24_v13 = vld [vmem:[%s2696_s0 + $0x68] sm:$0xff]  ;;  %v25_v14 = vld [vmem:[%s2696_s0 + $0x70] sm:$0xff] }
  0x14   :  { %1908 = vmatpush3.bf16.msra.mxu1 %v1905_v29  ;;  %v26_v15 = vld [vmem:[%s2696_s0 + $0x78] sm:$0xff]  ;;  %v1367_v16 = vld [vmem:[%s2695_s1 + $0x150] sm:$0xff]  ;;  %v1369_v19 = vld [vmem:[%s2695_s1 + $0x160] sm:$0xff] }
  0x15   :  { %1880 = vmatpush3.bf16.msra.mxu0 %v1877_v26  ;;  %1910 = vmatprep.subr.bf16.mxu1 %v1909_v35  ;;  %v1368_v17 = vld [vmem:[%s2695_s1 + $0x158] sm:$0xff]  ;;  %v1371_v21 = vld [vmem:[%s2695_s1 + $0x170] sm:$0xff]  ;;  %vm2345_vm1 = vmpackc.low %vm547_vm0, %vm547_vm0 }
  0x16   :  { %1882 = vmatprep.subr.bf16.mxu0 %v1881_v32  ;;  %v1945_v18 = vpack.c.bf16 %v1368_v17, %v1367_v16  ;;  %v1372_v22 = vld [vmem:[%s2695_s1 + $0x178] sm:$0xff] }
  0x17   :  { %v1953_v23 = vpack.c.bf16 %v1372_v22, %v1371_v21 }
  0x18   :  { %1912 = vmatpush3.bf16.msra.mxu1 %v1909_v35 }
  0x19   :  { %1884 = vmatpush3.bf16.msra.mxu0 %v1881_v32  ;;  %1914 = vmatprep.subr.bf16.mxu1 %v1913_v41 }
  0x1a   :  { %1886 = vmatprep.subr.bf16.mxu0 %v1885_v38 }
  0x1c   :  { %1916 = vmatpush3.bf16.msra.mxu1 %v1913_v41 }
  0x1d   :  { %1888 = vmatpush3.bf16.msra.mxu0 %v1885_v38  ;;  %1918 = vmatprep.subr.bf16.mxu1 %v1917_v47 }
  0x1e   :  { %1890 = vmatprep.subr.bf16.mxu0 %v1889_v44 }
  0x20   :  { %1920 = vmatpush3.bf16.msra.mxu1 %v1917_v47 }
  0x21   :  { %1892 = vmatpush3.bf16.msra.mxu0 %v1889_v44  ;;  %1922 = vmatprep.subr.bf16.mxu1 %v1921_v53 }
  0x22   :  { %1926 = vmatprep.subr.bf16.mxu0 %v1925_v50 }
  0x24   :  { %1614 = vmatmul.mubr.f32.vlgmr.msra.gmra.mrb[0].mxu0 %v2234_v54  ;;  %1924 = vmatpush3.bf16.msra.mxu1 %v1921_v53 }
  0x25   :  { %1616 = vmatprep.mubr.f32.mxu0 %v2239_v55  ;;  %1928 = vmatpush3.bf16.msra.mxu0 %v1925_v50 }
  0x26   :  { %1930 = vmatprep.subr.bf16.mxu0 %v1929_v56 }
  0x27   :  { %1670 = vmatmul.mubr.f32.vlgmr.msra.gmra.mrb[0].mxu1 %v2234_v54 }
  0x28   :  { %1617 = vmatmul.mubr.f32.gmra.mrb[2].mxu0 %v2252_v59  ;;  %1672 = vmatprep.mubr.f32.mxu1 %v2239_v55 }
  0x29   :  { %1619 = vmatprep.mubr.f32.mxu0 %v2257_v60  ;;  %1932 = vmatpush3.bf16.msra.mxu0 %v1929_v56 }
  0x2a   :  { %1934 = vmatprep.subr.bf16.mxu0 %v1933_v61 }
  0x2b   :  { %1673 = vmatmul.mubr.f32.gmra.mrb[2].mxu1 %v2252_v59 }
  0x2c   :  { %1620 = vmatmul.mubr.f32.gmra.mrb[4].mxu0 %v2270_v0  ;;  %1675 = vmatprep.mubr.f32.mxu1 %v2257_v60 }
  0x2d   :  { %1622 = vmatprep.mubr.f32.mxu0 %v2275_v1  ;;  %1936 = vmatpush3.bf16.msra.mxu0 %v1933_v61 }
  0x2e   :  { %1938 = vmatprep.subr.bf16.mxu0 %v1937_v2 }
  0x2f   :  { %1676 = vmatmul.mubr.f32.gmra.mrb[4].mxu1 %v2270_v0 }
  0x30   :  { %1623 = vmatmul.mubr.f32.gmra.mrb[6].mxu0 %v18_v5  ;;  %1678 = vmatprep.mubr.f32.mxu1 %v2275_v1 }
  0x31   :  { %1625 = vmatprep.mubr.f32.mxu0 %v19_v6  ;;  %1940 = vmatpush3.bf16.msra.mxu0 %v1937_v2 }
  0x32   :  { %1942 = vmatprep.subr.bf16.mxu0 %v1941_v7 }
  0x33   :  { %1679 = vmatmul.mubr.f32.gmra.mrb[6].mxu1 %v18_v5 }
  0x34   :  { %1626 = vmatmul.mubr.f32.gmra.mrb[8].mxu0 %v20_v8  ;;  %1681 = vmatprep.mubr.f32.mxu1 %v19_v6 }
  0x35   :  { %1628 = vmatprep.mubr.f32.mxu0 %v21_v10  ;;  %1944 = vmatpush3.bf16.msra.mxu0 %v1941_v7 }
  0x36   :  { %1946 = vmatprep.subr.bf16.mxu0 %v1945_v18 }
  0x37   :  { %1682 = vmatmul.mubr.f32.gmra.mrb[8].mxu1 %v20_v8 }
  0x38   :  { %1629 = vmatmul.mubr.f32.gmra.mrb[10].mxu0 %v22_v11  ;;  %1684 = vmatprep.mubr.f32.mxu1 %v21_v10 }
  0x39   :  { %1631 = vmatprep.mubr.f32.mxu0 %v23_v12  ;;  %1948 = vmatpush3.bf16.msra.mxu0 %v1945_v18 }
  0x3b   :  { %1685 = vmatmul.mubr.f32.gmra.mrb[10].mxu1 %v22_v11 }
  0x3c   :  { %1632 = vmatmul.mubr.f32.gmra.mrb[12].mxu0 %v24_v13  ;;  %1687 = vmatprep.mubr.f32.mxu1 %v23_v12 }
  0x3d   :  { %1634 = vmatprep.mubr.f32.mxu0 %v25_v14 }
  0x3f   :  { %1688 = vmatmul.mubr.f32.gmra.mrb[12].mxu1 %v24_v13 }
  0x40   :  { %1635 = vmatmul.mubr.f32.gmra.mrb[14].mxu0 %v26_v15  ;;  %1690 = vmatprep.mubr.f32.mxu1 %v25_v14 }
  0x41   :  { %1725 = vmatprep.mubr.f32.mxu0 %v2137_v9  ;;  %v1370_v9 = vld [vmem:[%s2695_s1 + $0x168] sm:$0xff] }
  0x42   :  { %v1949_v20 = vpack.c.bf16 %v1370_v9, %v1369_v19 }
  0x43   :  { %1691 = vmatmul.mubr.f32.gmra.mrb[14].mxu1 %v26_v15 }
  0x44   :  { %1950 = vmatprep.subr.bf16.mxu0 %v1949_v20 }
  0x45   :  { %1952 = vmatpush3.bf16.msra.mxu0 %v1949_v20 }
  0x46   :  { %1954 = vmatprep.subr.bf16.mxu0 %v1953_v23 }
  0x49   :  { %1956 = vmatpush3.bf16.msra.mxu0 %v1953_v23 }
  0x4c   :  { %1726 = vmatmul.mubr.f32.vlgmr.msra.gmra.mrb[16].mxu0 %v2234_v54 }
  0x4d   :  { %1728 = vmatprep.mubr.f32.mxu0 %v2239_v55 }
  0x50   :  { %1729 = vmatmul.mubr.f32.gmra.mrb[18].mxu0 %v2252_v59 }
  0x51   :  { %1731 = vmatprep.mubr.f32.mxu0 %v2257_v60 }
  0x54   :  { %1732 = vmatmul.mubr.f32.gmra.mrb[20].mxu0 %v2270_v0 }
  0x55   :  { %1734 = vmatprep.mubr.f32.mxu0 %v2275_v1 }
  0x58   :  { %1735 = vmatmul.mubr.f32.gmra.mrb[22].mxu0 %v18_v5 }
  0x59   :  { %1737 = vmatprep.mubr.f32.mxu0 %v19_v6 }
  0x5c   :  { %1738 = vmatmul.mubr.f32.gmra.mrb[24].mxu0 %v20_v8 }
  0x5d   :  { %1740 = vmatprep.mubr.f32.mxu0 %v21_v10 }
  0x60   :  { %1741 = vmatmul.mubr.f32.gmra.mrb[26].mxu0 %v22_v11 }
  0x61   :  { %1743 = vmatprep.mubr.f32.mxu0 %v23_v12 }
  0x64   :  { %1744 = vmatmul.mubr.f32.gmra.mrb[28].mxu0 %v24_v13 }
  0x65   :  { %1746 = vmatprep.mubr.f32.mxu0 %v25_v14 }
  0x68   :  { %1747 = vmatmul.mubr.f32.gmra.mrb[30].mxu0 %v26_v15 }
  0xf7   :  { %v1615_v24 = vpop.f32.mrb[0].mxu0 }
  0xf8   :  { %v109_v25 = vpop.f32.mrb[1].mxu0 }
  0xf9   :  { %v1957_v27 = vpack.c.bf16 %v1615_v24, %v109_v25 }
  0xfa   :  { %v1671_v31 = vpop.f32.mrb[0].mxu1 }
  0xfb   :  { %1959 = vmatprep.subr.msk.bf16.mxu1 %vm2345_vm1, %v1957_v27  ;;  %v1618_v28 = vpop.f32.mrb[2].mxu0  ;;  %v271_v32 = vpop.f32.mrb[1].mxu1  ;;  %v351_v2 = vmul.f32 0.088388346, %v1671_v31 }
  0xfc   :  { %1962 = vmatpush3.bf16.xpose.msk.msra.mxu1 %vm2345_vm1, %v1957_v27  ;;  %v119_v29 = vpop.f32.mrb[3].mxu0  ;;  %v350_v34 = vmul.f32 0.088388346, %v271_v32 }
  0xfd   :  { %v1963_v30 = vpack.c.bf16 %v1618_v28, %v119_v29 }
  0xfe   :  { %v1674_v37 = vpop.f32.mrb[2].mxu1  ;;  %1765 = vmatprep.mubr.msk.f32.mxu1 %vm547_vm0, %v350_v34 }
  0xff   :  { %v1621_v33 = vpop.f32.mrb[4].mxu0  ;;  %1965 = vmatprep.subr.msk.bf16.mxu1 %vm2345_vm1, %v1963_v30  ;;  %v281_v38 = vpop.f32.mrb[3].mxu1  ;;  %v353_v6 = vmul.f32 0.088388346, %v1674_v37 }
 0x100   :  { %v129_v35 = vpop.f32.mrb[5].mxu0  ;;  %v352_v1 = vmul.f32 0.088388346, %v281_v38 }
 0x101   :  { %v1969_v36 = vpack.c.bf16 %v1621_v33, %v129_v35 }
 0x102   :  { %v1677_v42 = vpop.f32.mrb[4].mxu1 }
 0x103   :  { %v1624_v39 = vpop.f32.mrb[6].mxu0  ;;  %v291_v43 = vpop.f32.mrb[5].mxu1  ;;  %v355_v7 = vmul.f32 0.088388346, %v1677_v42 }
 0x104   :  { %1968 = vmatpush3.bf16.xpose.msk.msra.mxu1 %vm2345_vm1, %v1963_v30  ;;  %v139_v40 = vpop.f32.mrb[7].mxu0  ;;  %v354_v5 = vmul.f32 0.088388346, %v291_v43 }
 0x105   :  { %1971 = vmatprep.subr.msk.bf16.mxu1 %vm2345_vm1, %v1969_v36  ;;  %v1975_v41 = vpack.c.bf16 %v1624_v39, %v139_v40 }
 0x106   :  { %v1680_v47 = vpop.f32.mrb[6].mxu1 }
 0x107   :  { %v1627_v44 = vpop.f32.mrb[8].mxu0  ;;  %v301_v48 = vpop.f32.mrb[7].mxu1  ;;  %v357_v10 = vmul.f32 0.088388346, %v1680_v47 }
 0x108   :  { %v149_v45 = vpop.f32.mrb[9].mxu0  ;;  %v356_v8 = vmul.f32 0.088388346, %v301_v48 }
 0x109   :  { %v1997_v46 = vpack.c.bf16 %v1627_v44, %v149_v45 }
 0x10a   :  { %v1683_v52 = vpop.f32.mrb[8].mxu1 }
 0x10b   :  { %1999 = vmatprep.subr.msk.bf16.mxu0 %vm2345_vm1, %v1997_v46  ;;  %v1630_v49 = vpop.f32.mrb[10].mxu0  ;;  %v311_v53 = vpop.f32.mrb[9].mxu1  ;;  %v359_v11 = vmul.f32 0.088388346, %v1683_v52 }
 0x10c   :  { %1974 = vmatpush3.bf16.xpose.msk.msra.mxu1 %vm2345_vm1, %v1969_v36  ;;  %2002 = vmatpush3.bf16.xpose.msk.msra.mxu0 %vm2345_vm1, %v1997_v46  ;;  %v159_v50 = vpop.f32.mrb[11].mxu0  ;;  %v358_v55 = vmul.f32 0.088388346, %v311_v53 }
 0x10d   :  { %1977 = vmatprep.subr.msk.bf16.mxu1 %vm2345_vm1, %v1975_v41  ;;  %v2003_v51 = vpack.c.bf16 %v1630_v49, %v159_v50 }
 0x10e   :  { %v1686_v58 = vpop.f32.mrb[10].mxu1  ;;  %1821 = vmatprep.mubr.msk.f32.mxu0 %vm547_vm0, %v358_v55 }
 0x10f   :  { %2005 = vmatprep.subr.msk.bf16.mxu0 %vm2345_vm1, %v2003_v51  ;;  %v1633_v54 = vpop.f32.mrb[12].mxu0  ;;  %v321_v59 = vpop.f32.mrb[11].mxu1  ;;  %v361_v13 = vmul.f32 0.088388346, %v1686_v58 }
 0x110   :  { %v169_v56 = vpop.f32.mrb[13].mxu0  ;;  %v360_v12 = vmul.f32 0.088388346, %v321_v59 }
 0x111   :  { %v2009_v57 = vpack.c.bf16 %v1633_v54, %v169_v56 }
 0x112   :  { %v1689_v63 = vpop.f32.mrb[12].mxu1 }
 0x113   :  { %v1636_v60 = vpop.f32.mrb[14].mxu0  ;;  %v331_v0 = vpop.f32.mrb[13].mxu1  ;;  %v363_v15 = vmul.f32 0.088388346, %v1689_v63 }
 0x114   :  { %1980 = vmatpush3.bf16.xpose.msk.msra.mxu1 %vm2345_vm1, %v1975_v41  ;;  %2008 = vmatpush3.bf16.xpose.msk.msra.mxu0 %vm2345_vm1, %v2003_v51  ;;  %v179_v61 = vpop.f32.mrb[15].mxu0  ;;  %v362_v14 = vmul.f32 0.088388346, %v331_v0  ;;  %v528_v41 = vlaneseq }
 0x115   :  { %2011 = vmatprep.subr.msk.bf16.mxu0 %vm2345_vm1, %v2009_v57  ;;  %v2015_v62 = vpack.c.bf16 %v1636_v60, %v179_v61 }
 0x116   :  { %v1692_v3 = vpop.f32.mrb[14].mxu1  ;;  %v529_v42 = vshrl.u32 %v528_v41, 7  ;;  %v2406_v43 = vand.u32 127, %v528_v41 }
 0x117   :  { %v341_v4 = vpop.f32.mrb[15].mxu1  ;;  %v365_v17 = vmul.f32 0.088388346, %v1692_v3 }
 0x118   :  { %v364_v16 = vmul.f32 0.088388346, %v341_v4  ;;  %v530_v44 = vadd.s32 8, %v529_v42  ;;  %vm539_vm2 = vcmp.le.s32.totalorder %v2406_v43, %v529_v42  ;;  %v531_v45 = vadd.s32 16, %v529_v42 }
 0x119   :  { %v532_v48 = vadd.s32 24, %v529_v42  ;;  %v533_v51 = vadd.s32 32, %v529_v42  ;;  %v534_v55 = vadd.s32 40, %v529_v42  ;;  %v535_v59 = vadd.s32 48, %v529_v42 }
 0x11a   :  { %vm540_vm4 = vcmp.le.s32.totalorder %v2406_v43, %v530_v44  ;;  %vm541_vm5 = vcmp.le.s32.totalorder %v2406_v43, %v531_v45  ;;  %v536_v63 = vadd.s32 56, %v529_v42 }
 0x11b   :  { %1766 = vmatmul.mubr.msk.f32.vlgmr.msra.gmra.mrb[16].mxu1 %vm547_vm0, %v351_v2  ;;  %vm542_vm6 = vcmp.le.s32.totalorder %v2406_v43, %v532_v48  ;;  %vm543_vm7 = vcmp.le.s32.totalorder %v2406_v43, %v533_v51  ;;  %vm544_vm8 = vcmp.le.s32.totalorder %v2406_v43, %v534_v55  ;;  %vm545_vm9 = vcmp.le.s32.totalorder %v2406_v43, %v535_v59 }
 0x11c   :  { %2014 = vmatpush3.bf16.xpose.msk.msra.mxu0 %vm2345_vm1, %v2009_v57  ;;  %1768 = vmatprep.mubr.msk.f32.mxu1 %vm547_vm0, %v352_v1  ;;  %vm546_vm10 = vcmp.le.s32.totalorder %v2406_v43, %v536_v63 }
 0x11d   :  { %2017 = vmatprep.subr.msk.bf16.mxu0 %vm2345_vm1, %v2015_v62 }
 0x11f   :  { %1769 = vmatmul.mubr.msk.f32.gmra.mrb[18].mxu1 %vm547_vm0, %v353_v6  ;;  %v1727_v18 = vpop.f32.mrb[16].mxu0 }
 0x120   :  { %1771 = vmatprep.mubr.msk.f32.mxu1 %vm547_vm0, %v354_v5  ;;  %v449_v19 = vpop.f32.mrb[17].mxu0 }
 0x121   :  { %v1981_v9 = vpack.c.bf16 %v1727_v18, %v449_v19 }
 0x123   :  { %1772 = vmatmul.mubr.msk.f32.gmra.mrb[20].mxu1 %vm547_vm0, %v355_v7  ;;  %v1730_v20 = vpop.f32.mrb[18].mxu0  ;;  %1982 = vmatprep.subr.bf16.mxu1 %v1981_v9 }
 0x124   :  { %2020 = vmatpush3.bf16.xpose.msk.msra.mxu0 %vm2345_vm1, %v2015_v62  ;;  %1774 = vmatprep.mubr.msk.f32.mxu1 %vm547_vm0, %v356_v8  ;;  %v459_v21 = vpop.f32.mrb[19].mxu0 }
 0x125   :  { %1984 = vmatpush3.bf16.msra.mxu1 %v1981_v9  ;;  %v1985_v22 = vpack.c.bf16 %v1730_v20, %v459_v21 }
 0x127   :  { %1775 = vmatmul.mubr.msk.f32.gmra.mrb[22].mxu1 %vm547_vm0, %v357_v10  ;;  %v1733_v23 = vpop.f32.mrb[20].mxu0  ;;  %1986 = vmatprep.subr.bf16.mxu1 %v1985_v22 }
 0x128   :  { %v469_v24 = vpop.f32.mrb[21].mxu0 }
 0x129   :  { %1988 = vmatpush3.bf16.msra.mxu1 %v1985_v22  ;;  %v1989_v25 = vpack.c.bf16 %v1733_v23, %v469_v24 }
 0x12b   :  { %1822 = vmatmul.mubr.msk.f32.vlgmr.msra.gmra.mrb[32].mxu0 %vm547_vm0, %v359_v11  ;;  %v1736_v26 = vpop.f32.mrb[22].mxu0  ;;  %1990 = vmatprep.subr.bf16.mxu1 %v1989_v25 }
 0x12c   :  { %1824 = vmatprep.mubr.msk.f32.mxu0 %vm547_vm0, %v360_v12  ;;  %v479_v27 = vpop.f32.mrb[23].mxu0 }
 0x12d   :  { %1992 = vmatpush3.bf16.msra.mxu1 %v1989_v25  ;;  %v1993_v28 = vpack.c.bf16 %v1736_v26, %v479_v27 }
 0x12f   :  { %1825 = vmatmul.mubr.msk.f32.gmra.mrb[34].mxu0 %vm547_vm0, %v361_v13  ;;  %1994 = vmatprep.subr.bf16.mxu1 %v1993_v28  ;;  %v1739_v29 = vpop.f32.mrb[24].mxu0 }
 0x130   :  { %1827 = vmatprep.mubr.msk.f32.mxu0 %vm547_vm0, %v362_v14  ;;  %v489_v30 = vpop.f32.mrb[25].mxu0 }
 0x131   :  { %1996 = vmatpush3.bf16.msra.mxu1 %v1993_v28  ;;  %v2397_v31 = vpack.c.bf16 %v1739_v29, %v489_v30 }
 0x133   :  { %1828 = vmatmul.mubr.msk.f32.gmra.mrb[36].mxu0 %vm547_vm0, %v363_v15  ;;  %v1742_v32 = vpop.f32.mrb[26].mxu0  ;;  %2022 = vmatprep.subr.bf16.mxu1 %v2397_v31 }
 0x134   :  { %1830 = vmatprep.mubr.msk.f32.mxu0 %vm547_vm0, %v364_v16  ;;  %v499_v33 = vpop.f32.mrb[27].mxu0 }
 0x135   :  { %v2400_v34 = vpack.c.bf16 %v1742_v32, %v499_v33 }
 0x137   :  { %1831 = vmatmul.mubr.msk.f32.gmra.mrb[38].mxu0 %vm547_vm0, %v365_v17  ;;  %v1745_v35 = vpop.f32.mrb[28].mxu0 }
 0x138   :  { %v509_v36 = vpop.f32.mrb[29].mxu0 }
 0x139   :  { %v2402_v37 = vpack.c.bf16 %v1745_v35, %v509_v36 }
 0x13b   :  { %v1748_v38 = vpop.f32.mrb[30].mxu0 }
 0x13c   :  { %v519_v39 = vpop.f32.mrb[31].mxu0 }
 0x13d   :  { %v2404_v40 = vpack.c.bf16 %v1748_v38, %v519_v39 }
 0x1ee   :  { %v1767_v46 = vpop.f32.mrb[16].mxu1 }
 0x1ef   :  { %v662_v47 = vpop.f32.mrb[17].mxu1  ;;  %v2419_v52 = vsel %vm540_vm4, %v1767_v46, -inf }
 0x1f0   :  { %v2412_v49 = vsel %vm539_vm2, %v662_v47, -inf  ;;  %v713_v57 = vsel %vm709_vm3, %v2419_v52, -inf }
 0x1f1   :  { %v710_v50 = vsel %vm709_vm3, %v2412_v49, -inf }
 0x1f2   :  { %711 = vmax.xlane.f32.xlu0 %v710_v50  ;;  %v1770_v53 = vpop.f32.mrb[18].mxu1 }
 0x1f3   :  { %v672_v54 = vpop.f32.mrb[19].mxu1  ;;  %v2433_v60 = vsel %vm542_vm6, %v1770_v53, -inf }
 0x1f4   :  { %v2424_v56 = vsel %vm541_vm5, %v672_v54, -inf  ;;  %v719_v1 = vsel %vm709_vm3, %v2433_v60, -inf }
 0x1f5   :  { %v716_v58 = vsel %vm709_vm3, %v2424_v56, -inf }
 0x1f6   :  { %714 = vmax.xlane.f32.xlu0 %v713_v57  ;;  %717 = vmax.xlane.f32.xlu1 %v716_v58  ;;  %v1773_v61 = vpop.f32.mrb[20].mxu1 }
 0x1f7   :  { %v682_v62 = vpop.f32.mrb[21].mxu1  ;;  %v2447_v3 = vsel %vm544_vm8, %v1773_v61, -inf }
 0x1f8   :  { %v2438_v0 = vsel %vm543_vm7, %v682_v62, -inf  ;;  %v725_v7 = vsel %vm709_vm3, %v2447_v3, -inf }
 0x1f9   :  { %v722_v2 = vsel %vm709_vm3, %v2438_v0, -inf }
 0x1fa   :  { %720 = vmax.xlane.f32.xlu1 %v719_v1  ;;  %723 = vmax.xlane.f32.xlu0 %v722_v2  ;;  %v1776_v4 = vpop.f32.mrb[22].mxu1 }
 0x1fb   :  { %v692_v5 = vpop.f32.mrb[23].mxu1  ;;  %v2460_v10 = vsel %vm546_vm10, %v1776_v4, -inf }
 0x1fc   :  { %v2452_v6 = vsel %vm545_vm9, %v692_v5, -inf  ;;  %v731_v14 = vsel %vm709_vm3, %v2460_v10, -inf }
 0x1fd   :  { %v728_v8 = vsel %vm709_vm3, %v2452_v6, -inf }
 0x1fe   :  { %726 = vmax.xlane.f32.xlu1 %v725_v7  ;;  %729 = vmax.xlane.f32.xlu0 %v728_v8  ;;  %v1823_v11 = vpop.f32.mrb[32].mxu0 }
 0x1ff   :  { %v1057_v12 = vpop.f32.mrb[33].mxu0  ;;  %v2472_v16 = vsel %vm540_vm4, %v1823_v11, -inf }
 0x200   :  { %v2464_v13 = vsel %vm539_vm2, %v1057_v12, -inf  ;;  %v1107_v9 = vsel %vm709_vm3, %v2472_v16, -inf }
 0x201   :  { %v1104_v15 = vsel %vm709_vm3, %v2464_v13, -inf }
 0x202   :  { %732 = vmax.xlane.f32.xlu1 %v731_v14  ;;  %1105 = vmax.xlane.f32.xlu0 %v1104_v15  ;;  %v1826_v17 = vpop.f32.mrb[34].mxu0 }
 0x203   :  { %v1067_v18 = vpop.f32.mrb[35].mxu0  ;;  %v2484_v21 = vsel %vm542_vm6, %v1826_v17, -inf }
 0x204   :  { %v2476_v19 = vsel %vm541_vm5, %v1067_v18, -inf  ;;  %v1113_v25 = vsel %vm709_vm3, %v2484_v21, -inf }
 0x205   :  { %v1110_v20 = vsel %vm709_vm3, %v2476_v19, -inf }
 0x206   :  { %1108 = vmax.xlane.f32.xlu1 %v1107_v9  ;;  %1111 = vmax.xlane.f32.xlu0 %v1110_v20  ;;  %v1829_v22 = vpop.f32.mrb[36].mxu0 }
 0x207   :  { %v1077_v23 = vpop.f32.mrb[37].mxu0  ;;  %v2496_v27 = vsel %vm544_vm8, %v1829_v22, -inf }
 0x208   :  { %v2488_v24 = vsel %vm543_vm7, %v1077_v23, -inf  ;;  %v1119_v32 = vsel %vm709_vm3, %v2496_v27, -inf }
 0x209   :  { %v1116_v26 = vsel %vm709_vm3, %v2488_v24, -inf }
 0x20a   :  { %1114 = vmax.xlane.f32.xlu1 %v1113_v25  ;;  %1117 = vmax.xlane.f32.xlu0 %v1116_v26  ;;  %v1832_v28 = vpop.f32.mrb[38].mxu0 }
 0x20b   :  { %v1087_v29 = vpop.f32.mrb[39].mxu0  ;;  %v2508_v35 = vsel %vm546_vm10, %v1832_v28, -inf }
 0x20c   :  { %v2500_v30 = vsel %vm545_vm9, %v1087_v29, -inf  ;;  %v1125_v36 = vsel %vm709_vm3, %v2508_v35, -inf }
 0x20d   :  { %v1122_v33 = vsel %vm709_vm3, %v2500_v30, -inf }
 0x20e   :  { %1120 = vmax.xlane.f32.xlu1 %v1119_v32  ;;  %1123 = vmax.xlane.f32.xlu0 %v1122_v33 }
 0x212   :  { %1126 = vmax.xlane.f32.xlu1 %v1125_v36 }
 0x27f   :  { %v712_v38 = vpop.xlane.xlu0 %711 }
 0x280   :  { %v734_v39 = vsub.f32 %v2412_v49, %v712_v38 }
 0x282   :  { %v742_v41 = vmul.f32 1.442695, %v734_v39 }
 0x283   :  { %v715_v42 = vpop.xlane.xlu0 %714  ;;  %v718_v44 = vpop.xlane.xlu1 %717 }
 0x284   :  { %2037 = vpow2.f32 %v742_v41  ;;  %v735_v45 = vsub.f32 %v2419_v52, %v715_v42  ;;  %v736_v46 = vsub.f32 %v2424_v56, %v718_v44 }
 0x286   :  { %v744_v43 = vmul.f32 1.442695, %v735_v45  ;;  %v746_v47 = vmul.f32 1.442695, %v736_v46 }
 0x287   :  { %v721_v48 = vpop.xlane.xlu1 %720  ;;  %v724_v50 = vpop.xlane.xlu0 %723 }
 0x288   :  { %2039 = vpow2.f32 %v744_v43  ;;  %v737_v51 = vsub.f32 %v2433_v60, %v721_v48  ;;  %v738_v53 = vsub.f32 %v2438_v0, %v724_v50 }
 0x289   :  { %2041 = vpow2.f32 %v746_v47 }
 0x28a   :  { %v748_v54 = vmul.f32 1.442695, %v737_v51  ;;  %v750_v49 = vmul.f32 1.442695, %v738_v53 }
 0x28b   :  { %v727_v55 = vpop.xlane.xlu1 %726  ;;  %v730_v57 = vpop.xlane.xlu0 %729 }
 0x28c   :  { %2043 = vpow2.f32 %v748_v54  ;;  %v739_v58 = vsub.f32 %v2447_v3, %v727_v55  ;;  %v740_v52 = vsub.f32 %v2452_v6, %v730_v57 }
 0x28d   :  { %2045 = vpow2.f32 %v750_v49 }
 0x28e   :  { %v2519_v56 = vpop.eup %2037  ;;  %v752_v59 = vmul.f32 1.442695, %v739_v58  ;;  %v754_v61 = vmul.f32 1.442695, %v740_v52 }
 0x28f   :  { %v733_v62 = vpop.xlane.xlu1 %732  ;;  %v1106_v63 = vpop.xlane.xlu0 %1105  ;;  %v758_v60 = vsel %vm709_vm3, %v2519_v56, 0.0 }
 0x290   :  { %2047 = vpow2.f32 %v752_v59  ;;  %v741_v0 = vsub.f32 %v2460_v10, %v733_v62  ;;  %v1128_v1 = vsub.f32 %v2464_v13, %v1106_v63  ;;  %759 = vadd.xlane.f32.xlu0 %v758_v60 }
 0x291   :  { %2049 = vpow2.f32 %v754_v61 }
 0x292   :  { %v2525_v2 = vpop.eup %2039  ;;  %v756_v3 = vmul.f32 1.442695, %v741_v0  ;;  %v1136_v4 = vmul.f32 1.442695, %v1128_v1 }
 0x293   :  { %v2527_v5 = vpop.eup %2041  ;;  %v1109_v6 = vpop.xlane.xlu1 %1108  ;;  %v761_v8 = vsel %vm709_vm3, %v2525_v2, 0.0 }
 0x294   :  { %v1112_v7 = vpop.xlane.xlu0 %1111  ;;  %2051 = vpow2.f32 %v756_v3  ;;  %v1129_v11 = vsub.f32 %v2472_v16, %v1109_v6  ;;  %762 = vadd.xlane.f32.xlu1 %v761_v8  ;;  %v764_v12 = vsel %vm709_vm3, %v2527_v5, 0.0 }
 0x295   :  { %v1130_v10 = vsub.f32 %v2476_v19, %v1112_v7  ;;  %2053 = vpow2.f32 %v1136_v4  ;;  %765 = vadd.xlane.f32.xlu0 %v764_v12 }
 0x296   :  { %v2535_v13 = vpop.eup %2043  ;;  %v1138_v14 = vmul.f32 1.442695, %v1129_v11 }
 0x297   :  { %v1140_v15 = vmul.f32 1.442695, %v1130_v10  ;;  %v2537_v17 = vpop.eup %2045  ;;  %v1115_v18 = vpop.xlane.xlu1 %1114  ;;  %v767_v20 = vsel %vm709_vm3, %v2535_v13, 0.0 }
 0x298   :  { %v1118_v9 = vpop.xlane.xlu0 %1117  ;;  %2055 = vpow2.f32 %v1138_v14  ;;  %v1131_v16 = vsub.f32 %v2484_v21, %v1115_v18  ;;  %768 = vadd.xlane.f32.xlu1 %v767_v20  ;;  %v770_v22 = vsel %vm709_vm3, %v2537_v17, 0.0 }
 0x299   :  { %v1132_v19 = vsub.f32 %v2488_v24, %v1118_v9  ;;  %2057 = vpow2.f32 %v1140_v15  ;;  %771 = vadd.xlane.f32.xlu0 %v770_v22 }
 0x29a   :  { %v2545_v23 = vpop.eup %2047  ;;  %v1142_v25 = vmul.f32 1.442695, %v1131_v16 }
 0x29b   :  { %v1144_v26 = vmul.f32 1.442695, %v1132_v19  ;;  %v2547_v28 = vpop.eup %2049  ;;  %v1121_v29 = vpop.xlane.xlu1 %1120  ;;  %v773_v33 = vsel %vm709_vm3, %v2545_v23, 0.0 }
 0x29c   :  { %v1124_v32 = vpop.xlane.xlu0 %1123  ;;  %2059 = vpow2.f32 %v1142_v25  ;;  %v1133_v21 = vsub.f32 %v2496_v27, %v1121_v29  ;;  %774 = vadd.xlane.f32.xlu1 %v773_v33  ;;  %v776_v36 = vsel %vm709_vm3, %v2547_v28, 0.0 }
 0x29d   :  { %v1134_v24 = vsub.f32 %v2500_v30, %v1124_v32  ;;  %2061 = vpow2.f32 %v1144_v26  ;;  %777 = vadd.xlane.f32.xlu0 %v776_v36 }
 0x29e   :  { %v2555_v38 = vpop.eup %2051  ;;  %v1146_v39 = vmul.f32 1.442695, %v1133_v21 }
 0x29f   :  { %v1148_v41 = vmul.f32 1.442695, %v1134_v24  ;;  %v2557_v42 = vpop.eup %2053  ;;  %v1127_v44 = vpop.xlane.xlu1 %1126  ;;  %v779_v45 = vsel %vm709_vm3, %v2555_v38, 0.0 }
 0x2a0   :  { %2063 = vpow2.f32 %v1146_v39  ;;  %v1135_v27 = vsub.f32 %v2508_v35, %v1127_v44  ;;  %780 = vadd.xlane.f32.xlu1 %v779_v45  ;;  %v1152_v30 = vsel %vm709_vm3, %v2557_v42, 0.0 }
 0x2a1   :  { %2065 = vpow2.f32 %v1148_v41  ;;  %1153 = vadd.xlane.f32.xlu0 %v1152_v30 }
 0x2a2   :  { %v2564_v46 = vpop.eup %2055  ;;  %v1150_v43 = vmul.f32 1.442695, %v1135_v27 }
 0x2a3   :  { %v2566_v47 = vpop.eup %2057  ;;  %v1155_v48 = vsel %vm709_vm3, %v2564_v46, 0.0 }
 0x2a4   :  { %2067 = vpow2.f32 %v1150_v43  ;;  %1156 = vadd.xlane.f32.xlu1 %v1155_v48  ;;  %v1158_v50 = vsel %vm709_vm3, %v2566_v47, 0.0 }
 0x2a5   :  { %1159 = vadd.xlane.f32.xlu0 %v1158_v50 }
 0x2a6   :  { %v2572_v35 = vpop.eup %2059 }
 0x2a7   :  { %v2574_v51 = vpop.eup %2061  ;;  %v1161_v53 = vsel %vm709_vm3, %v2572_v35, 0.0 }
 0x2a8   :  { %1162 = vadd.xlane.f32.xlu1 %v1161_v53  ;;  %v1164_v54 = vsel %vm709_vm3, %v2574_v51, 0.0 }
 0x2a9   :  { %1165 = vadd.xlane.f32.xlu0 %v1164_v54 }
 0x2aa   :  { %v2580_v49 = vpop.eup %2063 }
 0x2ab   :  { %v2582_v55 = vpop.eup %2065  ;;  %v1167_v57 = vsel %vm709_vm3, %v2580_v49, 0.0 }
 0x2ac   :  { %1168 = vadd.xlane.f32.xlu1 %v1167_v57  ;;  %v1170_v58 = vsel %vm709_vm3, %v2582_v55, 0.0 }
 0x2ad   :  { %1171 = vadd.xlane.f32.xlu0 %v1170_v58 }
 0x2ae   :  { %v2588_v52 = vpop.eup %2067 }
 0x2af   :  { %v1173_v59 = vsel %vm709_vm3, %v2588_v52, 0.0 }
 0x2b0   :  { %1174 = vadd.xlane.f32.xlu1 %v1173_v59 }
 0x31d   :  { %v760_v61 = vpop.xlane.xlu0 %759 }
 0x31e   :  { %2069 = vrcp.f32 %v760_v61 }
 0x321   :  { %v763_v62 = vpop.xlane.xlu1 %762 }
 0x322   :  { %2071 = vrcp.f32 %v763_v62  ;;  %v766_v63 = vpop.xlane.xlu0 %765 }
 0x323   :  { %2073 = vrcp.f32 %v766_v63 }
 0x325   :  { %v769_v60 = vpop.xlane.xlu1 %768 }
 0x326   :  { %2075 = vrcp.f32 %v769_v60  ;;  %v772_v0 = vpop.xlane.xlu0 %771 }
 0x327   :  { %2077 = vrcp.f32 %v772_v0 }
 0x328   :  { %v2070_v1 = vpop.eup %2069 }
 0x329   :  { %v775_v3 = vpop.xlane.xlu1 %774  ;;  %v798_v4 = vmul.f32 %v2070_v1, %v2519_v56 }
 0x32a   :  { %2079 = vrcp.f32 %v775_v3  ;;  %v778_v6 = vpop.xlane.xlu0 %777 }
 0x32b   :  { %2081 = vrcp.f32 %v778_v6  ;;  %1793 = vmatprep.mubr.msk.f32.mxu1 %vm709_vm3, %v798_v4 }
 0x32c   :  { %v2072_v7 = vpop.eup %2071 }
 0x32d   :  { %v2074_v8 = vpop.eup %2073  ;;  %v799_v11 = vmul.f32 %v2072_v7, %v2525_v2  ;;  %v781_v10 = vpop.xlane.xlu1 %780 }
 0x32e   :  { %2083 = vrcp.f32 %v781_v10  ;;  %v1154_v12 = vpop.xlane.xlu0 %1153  ;;  %v800_v14 = vmul.f32 %v2074_v8, %v2527_v5 }
 0x32f   :  { %2085 = vrcp.f32 %v1154_v12  ;;  %1794 = vmatmul.mubr.msk.f32.vlgmr.msra.gmra.mrb[24].mxu1 %vm709_vm3, %v799_v11 }
 0x330   :  { %v2076_v15 = vpop.eup %2075  ;;  %2024 = vmatpush3.bf16.msra.mxu1 %v2397_v31  ;;  %1796 = vmatprep.mubr.msk.f32.mxu1 %vm709_vm3, %v800_v14 }
 0x331   :  { %v2078_v56 = vpop.eup %2077  ;;  %2026 = vmatprep.subr.bf16.mxu1 %v2400_v34  ;;  %v1157_v18 = vpop.xlane.xlu1 %1156  ;;  %v801_v9 = vmul.f32 %v2076_v15, %v2535_v13 }
 0x332   :  { %2087 = vrcp.f32 %v1157_v18  ;;  %v1160_v2 = vpop.xlane.xlu0 %1159  ;;  %v802_v20 = vmul.f32 %v2078_v56, %v2537_v17 }
 0x333   :  { %2089 = vrcp.f32 %v1160_v2  ;;  %1797 = vmatmul.mubr.msk.f32.gmra.mrb[26].mxu1 %vm709_vm3, %v801_v9 }
 0x334   :  { %v2080_v5 = vpop.eup %2079  ;;  %2028 = vmatpush3.bf16.msra.mxu1 %v2400_v34  ;;  %1799 = vmatprep.mubr.msk.f32.mxu1 %vm709_vm3, %v802_v20 }
 0x335   :  { %v2082_v31 = vpop.eup %2081  ;;  %2030 = vmatprep.subr.bf16.mxu1 %v2402_v37  ;;  %v1163_v16 = vpop.xlane.xlu1 %1162  ;;  %v803_v19 = vmul.f32 %v2080_v5, %v2545_v23 }
 0x336   :  { %2091 = vrcp.f32 %v1163_v16  ;;  %v1166_v13 = vpop.xlane.xlu0 %1165  ;;  %v804_v22 = vmul.f32 %v2082_v31, %v2547_v28 }
 0x337   :  { %2093 = vrcp.f32 %v1166_v13  ;;  %1800 = vmatmul.mubr.msk.f32.gmra.mrb[28].mxu1 %vm709_vm3, %v803_v19 }
 0x338   :  { %v2084_v17 = vpop.eup %2083  ;;  %2032 = vmatpush3.bf16.msra.mxu1 %v2402_v37  ;;  %1802 = vmatprep.mubr.msk.f32.mxu1 %vm709_vm3, %v804_v22 }
 0x339   :  { %v2086_v34 = vpop.eup %2085  ;;  %2034 = vmatprep.subr.bf16.mxu1 %v2404_v40  ;;  %v1169_v25 = vpop.xlane.xlu1 %1168  ;;  %v805_v26 = vmul.f32 %v2084_v17, %v2555_v38 }
 0x33a   :  { %2095 = vrcp.f32 %v1169_v25  ;;  %v1172_v23 = vpop.xlane.xlu0 %1171  ;;  %v1192_v29 = vmul.f32 %v2086_v34, %v2557_v42 }
 0x33b   :  { %2097 = vrcp.f32 %v1172_v23  ;;  %1803 = vmatmul.mubr.msk.f32.gmra.mrb[30].mxu1 %vm709_vm3, %v805_v26 }
 0x33c   :  { %v2088_v28 = vpop.eup %2087  ;;  %2036 = vmatpush3.bf16.msra.mxu1 %v2404_v40  ;;  %1849 = vmatprep.mubr.msk.f32.mxu1 %vm709_vm3, %v1192_v29 }
 0x33d   :  { %v2090_v37 = vpop.eup %2089  ;;  %v1193_v32 = vmul.f32 %v2088_v28, %v2564_v46  ;;  %v1175_v33 = vpop.xlane.xlu1 %1174 }
 0x33e   :  { %2099 = vrcp.f32 %v1175_v33  ;;  %v1194_v21 = vmul.f32 %v2090_v37, %v2566_v47 }
 0x33f   :  { %1850 = vmatmul.mubr.msk.f32.vlgmr.msra.gmra.mrb[32].mxu1 %vm709_vm3, %v1193_v32 }
 0x340   :  { %v2092_v24 = vpop.eup %2091  ;;  %1852 = vmatprep.mubr.msk.f32.mxu1 %vm709_vm3, %v1194_v21 }
 0x341   :  { %v2094_v36 = vpop.eup %2093  ;;  %v1195_v38 = vmul.f32 %v2092_v24, %v2572_v35 }
 0x342   :  { %v1196_v39 = vmul.f32 %v2094_v36, %v2574_v51 }
 0x343   :  { %1853 = vmatmul.mubr.msk.f32.gmra.mrb[34].mxu1 %vm709_vm3, %v1195_v38 }
 0x344   :  { %v2096_v40 = vpop.eup %2095  ;;  %1855 = vmatprep.mubr.msk.f32.mxu1 %vm709_vm3, %v1196_v39 }
 0x345   :  { %v2098_v41 = vpop.eup %2097  ;;  %v1197_v42 = vmul.f32 %v2096_v40, %v2580_v49 }
 0x346   :  { %v1198_v44 = vmul.f32 %v2098_v41, %v2582_v55 }
 0x347   :  { %1856 = vmatmul.mubr.msk.f32.gmra.mrb[36].mxu1 %vm709_vm3, %v1197_v42 }
 0x348   :  { %v2100_v45 = vpop.eup %2099  ;;  %1858 = vmatprep.mubr.msk.f32.mxu1 %vm709_vm3, %v1198_v44 }
 0x349   :  { %v1199_v27 = vmul.f32 %v2100_v45, %v2588_v52 }
 0x34b   :  { %1859 = vmatmul.mubr.msk.f32.gmra.mrb[38].mxu1 %vm709_vm3, %v1199_v27 }
 0x402   :  { %v1795_v30 = vpop.f32.mrb[24].mxu1 }
 0x403   :  { %936 = vst.msk [vmem:[%s2697_s2 + $0x8] sm:$0xff] %vm547_vm0, %v1795_v30  ;;  %v896_v46 = vpop.f32.mrb[25].mxu1 }
 0x404   :  { %935 = vst.msk [vmem:[%s2697_s2] sm:$0xff] %vm547_vm0, %v896_v46 }
 0x406   :  { %v1798_v43 = vpop.f32.mrb[26].mxu1 }
 0x407   :  { %938 = vst.msk [vmem:[%s2697_s2 + $0x18] sm:$0xff] %vm547_vm0, %v1798_v43  ;;  %v906_v47 = vpop.f32.mrb[27].mxu1 }
 0x408   :  { %937 = vst.msk [vmem:[%s2697_s2 + $0x10] sm:$0xff] %vm547_vm0, %v906_v47 }
 0x40a   :  { %v1801_v48 = vpop.f32.mrb[28].mxu1 }
 0x40b   :  { %940 = vst.msk [vmem:[%s2697_s2 + $0x28] sm:$0xff] %vm547_vm0, %v1801_v48  ;;  %v916_v50 = vpop.f32.mrb[29].mxu1 }
 0x40c   :  { %939 = vst.msk [vmem:[%s2697_s2 + $0x20] sm:$0xff] %vm547_vm0, %v916_v50 }
 0x40e   :  { %v1804_v35 = vpop.f32.mrb[30].mxu1 }
 0x40f   :  { %942 = vst.msk [vmem:[%s2697_s2 + $0x38] sm:$0xff] %vm547_vm0, %v1804_v35  ;;  %v926_v51 = vpop.f32.mrb[31].mxu1 }
 0x410   :  { %941 = vst.msk [vmem:[%s2697_s2 + $0x30] sm:$0xff] %vm547_vm0, %v926_v51 }
 0x412   :  { %v1851_v53 = vpop.f32.mrb[32].mxu1 }
 0x413   :  { %1330 = vst.msk [vmem:[%s2697_s2 + $0x48] sm:$0xff] %vm547_vm0, %v1851_v53  ;;  %v1290_v54 = vpop.f32.mrb[33].mxu1 }
 0x414   :  { %1329 = vst.msk [vmem:[%s2697_s2 + $0x40] sm:$0xff] %vm547_vm0, %v1290_v54 }
 0x416   :  { %v1854_v49 = vpop.f32.mrb[34].mxu1 }
 0x417   :  { %1332 = vst.msk [vmem:[%s2697_s2 + $0x58] sm:$0xff] %vm547_vm0, %v1854_v49  ;;  %v1300_v55 = vpop.f32.mrb[35].mxu1 }
 0x418   :  { %1331 = vst.msk [vmem:[%s2697_s2 + $0x50] sm:$0xff] %vm547_vm0, %v1300_v55 }
 0x41a   :  { %v1857_v57 = vpop.f32.mrb[36].mxu1 }
 0x41b   :  { %1334 = vst.msk [vmem:[%s2697_s2 + $0x68] sm:$0xff] %vm547_vm0, %v1857_v57  ;;  %v1310_v58 = vpop.f32.mrb[37].mxu1 }
 0x41c   :  { %1333 = vst.msk [vmem:[%s2697_s2 + $0x60] sm:$0xff] %vm547_vm0, %v1310_v58 }
 0x41e   :  { %v1860_v52 = vpop.f32.mrb[38].mxu1 }
 0x41f   :  { %1336 = vst.msk [vmem:[%s2697_s2 + $0x78] sm:$0xff] %vm547_vm0, %v1860_v52  ;;  %v1320_v59 = vpop.f32.mrb[39].mxu1 }
 0x420   :  { %1335 = vst.msk [vmem:[%s2697_s2 + $0x70] sm:$0xff] %vm547_vm0, %v1320_v59 }

</bundles_post_ra>
